<compile_context>
chip_gen: v7x
topology: tpu7x:2x2x1
jax: 0.10.0
libtpu: 0.0.40
codegen_flags: <defaults>
</compile_context>

<pallas_src>
import functools

import numpy as np
import jax
import jax.numpy as jnp
from jax import lax
from jax.experimental import pallas as pl
from jax.experimental.pallas import tpu as pltpu


def _vmem_capacity_bytes():
    """Physical VMEM per TensorCore; conservative default if the query fails."""
    try:
        cap = getattr(pltpu.get_tpu_info(), "vmem_capacity_bytes", None)
        if cap:
            return int(cap)
    except Exception:
        pass
    return 64 << 20   # v7x per-core VMEM; safe lower bound for v5e/v6e too


def _pick_c_blk(C, per_channel_block_bytes, per_block_budget):
    """Largest legal channel group (multiple of 8, or full C) that fits the
    per-block VMEM budget, preferring >=2 grid steps (v7x megacore) when the
    resulting blocks stay large enough to amortize per-step overhead."""
    if C % 8 == 0:
        cands = [c for c in range(8, C + 1, 8) if C % c == 0]
    else:
        cands = [C]   # (8,128) rule: a non-multiple-of-8 block must be the full dim
    fitting = [c for c in cands if c * per_channel_block_bytes <= per_block_budget]
    # TODO(synk): if even the smallest legal group exceeds the budget (very large
    # B*H*W per channel), a two-pass (stats-accumulate then normalize) variant
    # would be needed; the single-pass block is used as-is in that case.
    c_blk = max(fitting) if fitting else min(cands)
    if C // c_blk < 2:
        smaller = [c for c in cands if c < C]
        if smaller and max(smaller) * per_channel_block_bytes >= (256 << 10):
            c_blk = max(smaller)   # give the second TensorCore work on v7x
    return c_blk


def _bn_plane(x, gamma, beta, eps, inv_count):
    """Training-mode BatchNorm of one plane tile x:(B,c,L); gamma/beta:(c,1)."""
    xb = jnp.sum(x, axis=0)                       # (c, L)  batch fold on the VPU
    sqb = jnp.sum(x * x, axis=0)                  # (c, L)  same traversal of x
    s = jnp.sum(xb, axis=1, keepdims=True)        # (c, 1)  one cross-lane reduce
    sq = jnp.sum(sqb, axis=1, keepdims=True)      # (c, 1)
    mean = s * inv_count
    var = jnp.maximum(sq * inv_count - mean * mean, 0.0)   # clamp cancellation
    scale = gamma * lax.rsqrt(var + eps)          # EUP rsqrt, no divides
    shift = beta - mean * scale
    return x * scale + shift                      # fused multiply-add, lane dense


def _complex_bn2d_kernel(params_ref, xr_ref, xi_ref, yr_ref, yi_ref, *,
                         eps, inv_count, c_blk, num_groups):
    # params_ref: (C, 4) VMEM-resident [gamma_r, beta_r, gamma_i, beta_i].
    if num_groups == 1:
        p = params_ref[...]                                   # (c_blk, 4)
    else:
        off = pl.multiple_of(pl.program_id(0) * c_blk, c_blk)
        p = params_ref[pl.ds(off, c_blk), :]                  # (c_blk, 4)
    yr_ref[...] = _bn_plane(xr_ref[...], p[:, 0:1], p[:, 1:2], eps, inv_count)
    yi_ref[...] = _bn_plane(xi_ref[...], p[:, 2:3], p[:, 3:4], eps, inv_count)


def complex_batchnorm2d_forward(x, gamma_r, beta_r, gamma_i, beta_i, eps=1e-5):
    """ComplexBatchNorm2d.forward: rbn(x.real) + 1j * ibn(x.imag)."""
    B, C, H, W = x.shape
    L = H * W
    real_dt = jnp.real(x).dtype

    # Unavoidable complex->planar glue (no complex dtype in Mosaic); the
    # (H, W) -> H*W fold is contiguous and free.
    xr = jnp.real(x).astype(jnp.float32).reshape(B, C, L)
    xi = jnp.imag(x).astype(jnp.float32).reshape(B, C, L)

    # Lane-dense stores: pad H*W up to a multiple of 128.  Pads are zeros, so
    # sums / sums-of-squares are untouched; the true count is baked in below.
    L_pad = ((L + 127) // 128) * 128
    if L_pad != L:
        pad = ((0, 0), (0, 0), (0, L_pad - L))
        xr = jnp.pad(xr, pad)
        xi = jnp.pad(xi, pad)

    # gamma/beta packed channel-major -> one small, VMEM-resident input.
    params = jnp.stack([gamma_r, beta_r, gamma_i, beta_i], axis=1).astype(jnp.float32)

    # Adaptive channel-group size under a per-generation VMEM budget.
    cap = _vmem_capacity_bytes()
    footprint_budget = min(int(cap * 0.4), 48 << 20)    # double-buffered in+out
    per_block_budget = footprint_budget // 8            # 2 buffers x 4 arrays
    per_channel_block_bytes = B * L_pad * 4
    c_blk = _pick_c_blk(C, per_channel_block_bytes, per_block_budget)
    num_groups = C // c_blk

    block_bytes = B * c_blk * L_pad * 4
    params_bytes = ((C + 7) // 8) * 8 * 128 * 4
    needed = 8 * block_bytes + 2 * params_bytes + (2 << 20)
    vmem_limit = int(min(max(needed, 32 << 20), cap))

    inv_count = 1.0 / float(B * L)                       # true count, pad excluded
    kernel = functools.partial(_complex_bn2d_kernel, eps=float(eps),
                               inv_count=inv_count, c_blk=c_blk,
                               num_groups=num_groups)

    yr, yi = pl.pallas_call(
        kernel,
        out_shape=(jax.ShapeDtypeStruct((B, C, L_pad), jnp.float32),
                   jax.ShapeDtypeStruct((B, C, L_pad), jnp.float32)),
        grid=(num_groups,),
        in_specs=[
            pl.BlockSpec((C, 4), lambda c: (0, 0)),              # params: resident
            pl.BlockSpec((B, c_blk, L_pad), lambda c: (0, c, 0)),  # xr group
            pl.BlockSpec((B, c_blk, L_pad), lambda c: (0, c, 0)),  # xi group
        ],
        out_specs=[
            pl.BlockSpec((B, c_blk, L_pad), lambda c: (0, c, 0)),
            pl.BlockSpec((B, c_blk, L_pad), lambda c: (0, c, 0)),
        ],
        compiler_params=pltpu.CompilerParams(
            dimension_semantics=("parallel",),
            vmem_limit_bytes=vmem_limit),
    )(params, xr, xi)

    if L_pad != L:
        yr = yr[:, :, :L]
        yi = yi[:, :, :L]
    yr = yr.reshape(B, C, H, W).astype(real_dt)
    yi = yi.reshape(B, C, H, W).astype(real_dt)
    return lax.complex(yr, yi)

# TODO(synk): running_mean/running_var momentum updates (training-time side
# effects) and the eval-mode path that normalizes with tracked running
# statistics are not implemented; they do not affect the returned value here.


def complex_batchnorm2d_ref(x, gamma_r, beta_r, gamma_i, beta_i, eps=1e-5):
    """Pure-JAX reference mirroring PyTorch training-mode BatchNorm2d per plane."""
    def bn(v, g, b):
        mean = jnp.mean(v, axis=(0, 2, 3), keepdims=True)
        var = jnp.mean((v - mean) ** 2, axis=(0, 2, 3), keepdims=True)  # biased
        return ((v - mean) / jnp.sqrt(var + eps)
                * g.reshape(1, -1, 1, 1) + b.reshape(1, -1, 1, 1))
    return lax.complex(bn(jnp.real(x), gamma_r, beta_r),
                       bn(jnp.imag(x), gamma_i, beta_i))


if __name__ == "__main__":
    def _run_case(key, B, C, H, W, eps=1e-5):
        kr, ki, kgr, kbr, kgi, kbi = jax.random.split(key, 6)
        xr = jax.random.normal(kr, (B, C, H, W), dtype=jnp.float32)
        xi = jax.random.normal(ki, (B, C, H, W), dtype=jnp.float32)
        x = lax.complex(xr, xi)                               # complex64 NCHW
        gamma_r = jax.random.uniform(kgr, (C,), minval=0.5, maxval=1.5,
                                     dtype=jnp.float32)
        beta_r = 0.1 * jax.random.normal(kbr, (C,), dtype=jnp.float32)
        gamma_i = jax.random.uniform(kgi, (C,), minval=0.5, maxval=1.5,
                                     dtype=jnp.float32)
        beta_i = 0.1 * jax.random.normal(kbi, (C,), dtype=jnp.float32)

        out = jax.block_until_ready(
            complex_batchnorm2d_forward(x, gamma_r, beta_r, gamma_i, beta_i, eps))
        ref = jax.block_until_ready(
            complex_batchnorm2d_ref(x, gamma_r, beta_r, gamma_i, beta_i, eps))

        assert out.shape == x.shape and out.dtype == x.dtype
        np.testing.assert_allclose(np.asarray(out), np.asarray(ref),
                                   rtol=2e-4, atol=2e-4)

    key = jax.random.PRNGKey(0)
    k1, k2 = jax.random.split(key)
    _run_case(k1, 2, 4, 16, 16)     # single channel group (grid=(1,))
    _run_case(k2, 2, 16, 64, 64)    # multi-group grid + in-kernel param slice
    print("KERNEL_OK")
</pallas_src>

<mosaic_0001>
module attributes {stable_mosaic.version = 11 : i64} {
  func.func @_complex_bn2d_kernel(%arg0: i32, %arg1: memref<4x4xf32, #tpu.memory_space<vmem>>, %arg2: memref<2x4x256xf32, #tpu.memory_space<vmem>>, %arg3: memref<2x4x256xf32, #tpu.memory_space<vmem>>, %arg4: memref<2x4x256xf32, #tpu.memory_space<vmem>>, %arg5: memref<2x4x256xf32, #tpu.memory_space<vmem>>) attributes {dimension_semantics = [#tpu.dimension_semantics<parallel>], iteration_bounds = array<i64: 1>, scalar_prefetch = 0 : i64, scratch_operands = 0 : i64, tpu.core_type = #tpu.core_type<tc>, window_params = [{pipeline_mode = #tpu.pipeline_mode<synchronous>, transform_indices = @transform_0, window_bounds = array<i64: 4, 4>}, {transform_indices = @transform_1, window_bounds = array<i64: 2, 4, 256>}, {transform_indices = @transform_2, window_bounds = array<i64: 2, 4, 256>}, {transform_indices = @transform_3, window_bounds = array<i64: 2, 4, 256>}, {transform_indices = @transform_4, window_bounds = array<i64: 2, 4, 256>}]} {
    %c0 = arith.constant 0 : index
    %c0_0 = arith.constant 0 : index
    %0 = vector.load %arg1[%c0, %c0_0] : memref<4x4xf32, #tpu.memory_space<vmem>>, vector<4x4xf32>
    %c0_1 = arith.constant 0 : index
    %c0_2 = arith.constant 0 : index
    %c0_3 = arith.constant 0 : index
    %1 = vector.load %arg2[%c0_1, %c0_2, %c0_3] : memref<2x4x256xf32, #tpu.memory_space<vmem>>, vector<2x4x256xf32>
    %2 = vector.extract_strided_slice %0 {offsets = [0, 0], sizes = [4, 1], strides = [1, 1]} : vector<4x4xf32> to vector<4x1xf32>
    %3 = vector.extract_strided_slice %0 {offsets = [0, 1], sizes = [4, 1], strides = [1, 1]} : vector<4x4xf32> to vector<4x1xf32>
    %cst = arith.constant dense<0.000000e+00> : vector<4x256xf32>
    %4 = vector.multi_reduction <add>, %1, %cst [0] : vector<2x4x256xf32> to vector<4x256xf32>
    %5 = arith.mulf %1, %1 : vector<2x4x256xf32>
    %cst_4 = arith.constant dense<0.000000e+00> : vector<4x256xf32>
    %6 = vector.multi_reduction <add>, %5, %cst_4 [0] : vector<2x4x256xf32> to vector<4x256xf32>
    %cst_5 = arith.constant dense<0.000000e+00> : vector<4xf32>
    %7 = vector.multi_reduction <add>, %4, %cst_5 [1] : vector<4x256xf32> to vector<4xf32>
    %8 = vector.shape_cast %7 : vector<4xf32> to vector<4x1xf32>
    %cst_6 = arith.constant dense<0.000000e+00> : vector<4xf32>
    %9 = vector.multi_reduction <add>, %6, %cst_6 [1] : vector<4x256xf32> to vector<4xf32>
    %10 = vector.shape_cast %9 : vector<4xf32> to vector<4x1xf32>
    %cst_7 = arith.constant 0.001953125 : f32
    %11 = vector.broadcast %cst_7 : f32 to vector<4x1xf32>
    %12 = arith.mulf %8, %11 : vector<4x1xf32>
    %cst_8 = arith.constant 0.001953125 : f32
    %13 = vector.broadcast %cst_8 : f32 to vector<4x1xf32>
    %14 = arith.mulf %10, %13 : vector<4x1xf32>
    %15 = arith.mulf %12, %12 : vector<4x1xf32>
    %16 = arith.subf %14, %15 : vector<4x1xf32>
    %cst_9 = arith.constant 0.000000e+00 : f32
    %17 = vector.broadcast %cst_9 : f32 to vector<4x1xf32>
    %18 = arith.maximumf %16, %17 : vector<4x1xf32>
    %cst_10 = arith.constant 9.99999974E-6 : f32
    %19 = vector.broadcast %cst_10 : f32 to vector<4x1xf32>
    %20 = arith.addf %18, %19 : vector<4x1xf32>
    %21 = math.rsqrt %20 : vector<4x1xf32>
    %22 = arith.mulf %2, %21 : vector<4x1xf32>
    %23 = arith.mulf %12, %22 : vector<4x1xf32>
    %24 = arith.subf %3, %23 : vector<4x1xf32>
    %25 = vector.shape_cast %22 : vector<4x1xf32> to vector<1x4x1xf32>
    %26 = vector.broadcast %25 : vector<1x4x1xf32> to vector<2x4x256xf32>
    %27 = arith.mulf %1, %26 : vector<2x4x256xf32>
    %28 = vector.shape_cast %24 : vector<4x1xf32> to vector<1x4x1xf32>
    %29 = vector.broadcast %28 : vector<1x4x1xf32> to vector<2x4x256xf32>
    %30 = arith.addf %27, %29 : vector<2x4x256xf32>
    %c0_11 = arith.constant 0 : index
    %c0_12 = arith.constant 0 : index
    %c0_13 = arith.constant 0 : index
    %31 = vector.load %arg4[%c0_11, %c0_12, %c0_13] : memref<2x4x256xf32, #tpu.memory_space<vmem>>, vector<2x4x256xf32>
    tpu.vector_store %arg4[%c0_11, %c0_12, %c0_13], %30 {strides = array<i32>} : memref<2x4x256xf32, #tpu.memory_space<vmem>>, vector<2x4x256xf32>,
    %c0_14 = arith.constant 0 : index
    %c0_15 = arith.constant 0 : index
    %c0_16 = arith.constant 0 : index
    %32 = vector.load %arg3[%c0_14, %c0_15, %c0_16] : memref<2x4x256xf32, #tpu.memory_space<vmem>>, vector<2x4x256xf32>
    %33 = vector.extract_strided_slice %0 {offsets = [0, 2], sizes = [4, 1], strides = [1, 1]} : vector<4x4xf32> to vector<4x1xf32>
    %34 = vector.extract_strided_slice %0 {offsets = [0, 3], sizes = [4, 1], strides = [1, 1]} : vector<4x4xf32> to vector<4x1xf32>
    %cst_17 = arith.constant dense<0.000000e+00> : vector<4x256xf32>
    %35 = vector.multi_reduction <add>, %32, %cst_17 [0] : vector<2x4x256xf32> to vector<4x256xf32>
    %36 = arith.mulf %32, %32 : vector<2x4x256xf32>
    %cst_18 = arith.constant dense<0.000000e+00> : vector<4x256xf32>
    %37 = vector.multi_reduction <add>, %36, %cst_18 [0] : vector<2x4x256xf32> to vector<4x256xf32>
    %cst_19 = arith.constant dense<0.000000e+00> : vector<4xf32>
    %38 = vector.multi_reduction <add>, %35, %cst_19 [1] : vector<4x256xf32> to vector<4xf32>
    %39 = vector.shape_cast %38 : vector<4xf32> to vector<4x1xf32>
    %cst_20 = arith.constant dense<0.000000e+00> : vector<4xf32>
    %40 = vector.multi_reduction <add>, %37, %cst_20 [1] : vector<4x256xf32> to vector<4xf32>
    %41 = vector.shape_cast %40 : vector<4xf32> to vector<4x1xf32>
    %cst_21 = arith.constant 0.001953125 : f32
    %42 = vector.broadcast %cst_21 : f32 to vector<4x1xf32>
    %43 = arith.mulf %39, %42 : vector<4x1xf32>
    %cst_22 = arith.constant 0.001953125 : f32
    %44 = vector.broadcast %cst_22 : f32 to vector<4x1xf32>
    %45 = arith.mulf %41, %44 : vector<4x1xf32>
    %46 = arith.mulf %43, %43 : vector<4x1xf32>
    %47 = arith.subf %45, %46 : vector<4x1xf32>
    %cst_23 = arith.constant 0.000000e+00 : f32
    %48 = vector.broadcast %cst_23 : f32 to vector<4x1xf32>
    %49 = arith.maximumf %47, %48 : vector<4x1xf32>
    %cst_24 = arith.constant 9.99999974E-6 : f32
    %50 = vector.broadcast %cst_24 : f32 to vector<4x1xf32>
    %51 = arith.addf %49, %50 : vector<4x1xf32>
    %52 = math.rsqrt %51 : vector<4x1xf32>
    %53 = arith.mulf %33, %52 : vector<4x1xf32>
    %54 = arith.mulf %43, %53 : vector<4x1xf32>
    %55 = arith.subf %34, %54 : vector<4x1xf32>
    %56 = vector.shape_cast %53 : vector<4x1xf32> to vector<1x4x1xf32>
    %57 = vector.broadcast %56 : vector<1x4x1xf32> to vector<2x4x256xf32>
    %58 = arith.mulf %32, %57 : vector<2x4x256xf32>
    %59 = vector.shape_cast %55 : vector<4x1xf32> to vector<1x4x1xf32>
    %60 = vector.broadcast %59 : vector<1x4x1xf32> to vector<2x4x256xf32>
    %61 = arith.addf %58, %60 : vector<2x4x256xf32>
    %c0_25 = arith.constant 0 : index
    %c0_26 = arith.constant 0 : index
    %c0_27 = arith.constant 0 : index
    %62 = vector.load %arg5[%c0_25, %c0_26, %c0_27] : memref<2x4x256xf32, #tpu.memory_space<vmem>>, vector<2x4x256xf32>
    tpu.vector_store %arg5[%c0_25, %c0_26, %c0_27], %61 {strides = array<i32>} : memref<2x4x256xf32, #tpu.memory_space<vmem>>, vector<2x4x256xf32>,
    return
  }
  func.func @transform_0(%arg0: i32) -> (i32, i32) {
    %c0_i32 = arith.constant 0 : i32
    %c0_i32_0 = arith.constant 0 : i32
    %c0_i32_1 = arith.constant 0 : i32
    return %c0_i32, %c0_i32_0 : i32, i32
  }
  func.func @transform_1(%arg0: i32) -> (i32, i32, i32) {
    %c0_i32 = arith.constant 0 : i32
    %c0_i32_0 = arith.constant 0 : i32
    %c0_i32_1 = arith.constant 0 : i32
    return %c0_i32, %arg0, %c0_i32_0 : i32, i32, i32
  }
  func.func @transform_2(%arg0: i32) -> (i32, i32, i32) {
    %c0_i32 = arith.constant 0 : i32
    %c0_i32_0 = arith.constant 0 : i32
    %c0_i32_1 = arith.constant 0 : i32
    return %c0_i32, %arg0, %c0_i32_0 : i32, i32, i32
  }
  func.func @transform_3(%arg0: i32) -> (i32, i32, i32) {
    %c0_i32 = arith.constant 0 : i32
    %c0_i32_0 = arith.constant 0 : i32
    %c0_i32_1 = arith.constant 0 : i32
    return %c0_i32, %arg0, %c0_i32_0 : i32, i32, i32
  }
  func.func @transform_4(%arg0: i32) -> (i32, i32, i32) {
    %c0_i32 = arith.constant 0 : i32
    %c0_i32_0 = arith.constant 0 : i32
    %c0_i32_1 = arith.constant 0 : i32
    return %c0_i32, %arg0, %c0_i32_0 : i32, i32, i32
  }
}

</mosaic_0001>

<bundles_post_ra>
// kernel: tpu_custom_call.1
= control target key start
LH: loop header
LB: loop body
LE: loop exit
PB: predicated region body
PF: predicated region fallthrough
CT: control target
= control target key end

     0   :  { %10 = vsyncpa [#allocation3], 0  ;;  %s567_s0 = inlined_call_operand.hbm [shape: f32[4,4], index: 0, kind: input, shape index: {}]   ;;  %s568_s1 = inlined_call_operand.hbm [shape: f32[2,4,256], index: 1, kind: input, shape index: {}]   ;;  %s569_s2 = inlined_call_operand.hbm [shape: f32[2,4,256], index: 2, kind: input, shape index: {}]   ;;  %s570_s3 = inlined_call_operand.hbm [shape: f32[2,4,256], index: 3, kind: output, shape index: {0}]   ;;  %s571_s4 = inlined_call_operand.hbm [shape: f32[2,4,256], index: 4, kind: output, shape index: {1}]  }
   0x1   :  { %11 = vsyncpa [#allocation6], 0 }
   0x2   :  { %12 = vsyncpa [#allocation4], 0 }
   0x3   :  { %13 = vsyncpa [#allocation10], 0  ;;  %s401_s15 = smov [#allocation5]   ;;  %s283_s19 = scalar_lea.hbm %s568_s1, 256 }
   0x4   :  { %s29_s16 = sshll.u32 %s401_s15, 4  ;;  %p284_p0 = scmp.ne.s32.totalorder %s568_s1, %s283_s19  ;;  %s30_s16 = int_to_ptr.vmem [resolvable:$true] %s29_s16 }
   0x5   :  { %p287_p1 = scmp.lt.u32.totalorder %s283_s19, %s568_s1 }
   0x7   :  { %p289_p2 = pnand %p287_p1, %p284_p0 }
   0x9   :  { %292 = shalt.err (!%p289_p2)
}
   0xa   :  { %s293_s24 = scalar_lea.vmem %s30_s16, 256  ;;  %p298_p4 = scmp.lt.s32.totalorder %s30_s16, %s30_s16 }
   0xb   :  { %p294_p3 = scmp.ne.s32.totalorder %s30_s16, %s293_s24  ;;  %p299_p5 = scmp.lt.s32.totalorder %s293_s24, %s293_s24 }
   0xd   :  { %p300_p6 = por %p299_p5, %p298_p4 }
   0xf   :  { %p301_p7 = pnand %p300_p6, %p294_p3 }
  0x11   :  { %304 = shalt.err (!%p301_p7)
}
  0x12   :  { %s402_s25 = smov 128   ;;  %s403_s26 = smov 8  }
  0x13   :  { %35 = dma.hbm_to_vmem [thread:$0]  %s568_s1, 256, %s30_s16, [#allocation6], %s402_s25, %s402_s25, %s403_s26  }
  0x14   :  { %s404_s29 = smov [#allocation2]   ;;  %s405_s5 = smov [#allocation7]  }
  0x15   :  { %s20_s30 = sshll.u32 %s404_s29, 4  ;;  %s41_s6 = sshll.u32 %s405_s5, 4  ;;  %s21_s30 = int_to_ptr.vmem [resolvable:$true] %s20_s30  ;;  %s42_s6 = int_to_ptr.vmem [resolvable:$true] %s41_s6 }
  0x16   :  { %s305_s9 = scalar_lea.hbm %s567_s0, 64 }
  0x17   :  { %p306_p8 = scmp.ne.s32.totalorder %s567_s0, %s305_s9  ;;  %p309_p9 = scmp.lt.u32.totalorder %s305_s9, %s567_s0 }
  0x19   :  { %p311_p10 = pnand %p309_p9, %p306_p8 }
  0x1b   :  { %314 = shalt.err (!%p311_p10)
}
  0x1c   :  { %s315_s1 = scalar_lea.vmem %s21_s30, 64  ;;  %p320_p12 = scmp.lt.s32.totalorder %s21_s30, %s21_s30 }
  0x1d   :  { %p316_p11 = scmp.ne.s32.totalorder %s21_s30, %s315_s1  ;;  %p321_p13 = scmp.lt.s32.totalorder %s315_s1, %s315_s1 }
  0x1f   :  { %p322_p0 = por %p321_p13, %p320_p12 }
  0x21   :  { %p323_p1 = pnand %p322_p0, %p316_p11 }
  0x23   :  { %326 = shalt.err (!%p323_p1)
}
  0x24   :  { %23 = dma.hbm_to_vmem [thread:$0]  %s567_s0, 64, %s21_s30, [#allocation3]  }
  0x25   :  { %s327_s18 = scalar_lea.hbm %s569_s2, 256 }
  0x26   :  { %p328_p2 = scmp.ne.s32.totalorder %s569_s2, %s327_s18  ;;  %p331_p3 = scmp.lt.u32.totalorder %s327_s18, %s569_s2 }
  0x28   :  { %p333_p4 = pnand %p331_p3, %p328_p2 }
  0x2a   :  { %336 = shalt.err (!%p333_p4)
}
  0x2b   :  { %s337_s23 = scalar_lea.vmem %s42_s6, 256  ;;  %p342_p6 = scmp.lt.s32.totalorder %s42_s6, %s42_s6 }
  0x2c   :  { %p338_p5 = scmp.ne.s32.totalorder %s42_s6, %s337_s23  ;;  %p343_p7 = scmp.lt.s32.totalorder %s337_s23, %s337_s23 }
  0x2e   :  { %p344_p8 = por %p343_p7, %p342_p6 }
  0x30   :  { %p345_p9 = pnand %p344_p8, %p338_p5 }
  0x32   :  { %348 = shalt.err (!%p345_p9)
}
  0x33   :  { %47 = dma.hbm_to_vmem [thread:$0]  %s569_s2, 256, %s42_s6, [#allocation6], %s402_s25, %s402_s25, %s403_s26  }
  0x34   :  { %393 = dma.done.wait [#allocation3], 64  }
  0x35   :  { %394 = vsyncadd [#allocation3], 4294967232 }
  0x36   :  { %395 = dma.done.wait [#allocation6], 512  }
  0x37   :  { %396 = vsyncadd [#allocation6], 4294966784  ;;  %vm66_vm0 = vcmask 1043456   ;;  %v481_v0 = vld [vmem:[#allocation5] sm:$0xff]  ;;  %v483_v1 = vld [vmem:[#allocation5 + $0x8] sm:$0xff]  ;;  %v406_v52 = vmov 0  }
  0x38   :  { %v485_v2 = vld [vmem:[#allocation7] sm:$0xff]  ;;  %v62_v3 = vcombine.high %v481_v0, %v481_v0  ;;  %v63_v4 = vcombine.high %v483_v1, %v483_v1  ;;  %v67_v5 = vsel %vm66_vm0, %v481_v0, 0.0  ;;  %v68_v6 = vsel %vm66_vm0, %v483_v1, 0.0  ;;  %v495_v7 = vld [vmem:[#allocation7 + $0x8] sm:$0xff]  ;;  %270 = vset.pattern.permute.xlu1 %v406_v52  ;;  %s408_s2 = smov 1   ;;  %s412_s27 = smov [#allocation8]  }
  0x39   :  { %v69_v8 = vadd.f32 %v68_v6, %v67_v5  ;;  %v73_v9 = vmul.f32 %v481_v0, %v481_v0  ;;  %v74_v10 = vmul.f32 %v483_v1, %v483_v1  ;;  %v145_v11 = vcombine.high %v485_v2, %v485_v2  ;;  %s228_s28 = sshll.u32 %s412_s27, 4  ;;  %s413_s29 = smov [#allocation9]   ;;  %s229_s28 = int_to_ptr.vmem [resolvable:$true] %s228_s28 }
  0x3a   :  { %v70_v12 = vsel %vm66_vm0, %v62_v3, 0.0  ;;  %v71_v13 = vsel %vm66_vm0, %v63_v4, 0.0  ;;  %v146_v14 = vcombine.high %v495_v7, %v495_v7  ;;  %v149_v15 = vsel %vm66_vm0, %v485_v2, 0.0  ;;  %s240_s30 = sshll.u32 %s413_s29, 4  ;;  %s349_s5 = scalar_lea.vmem %s229_s28, 256  ;;  %s241_s30 = int_to_ptr.vmem [resolvable:$true] %s240_s30 }
  0x3b   :  { %v72_v16 = vadd.f32 %v71_v13, %v70_v12  ;;  %v87_v17 = vsel %vm66_vm0, %v69_v8, 0.0  ;;  %v77_v18 = vcombine.high %v73_v9, %v73_v9  ;;  %v78_v19 = vcombine.high %v74_v10, %v74_v10  ;;  %p350_p10 = scmp.ne.s32.totalorder %s229_s28, %s349_s5  ;;  %p354_p11 = scmp.lt.s32.totalorder %s229_s28, %s229_s28 }
  0x3c   :  { %v81_v20 = vsel %vm66_vm0, %v73_v9, 0.0  ;;  %v82_v21 = vsel %vm66_vm0, %v74_v10, 0.0  ;;  %v150_v22 = vsel %vm66_vm0, %v495_v7, 0.0  ;;  %v152_v23 = vsel %vm66_vm0, %v145_v11, 0.0  ;;  %v57_v10 = vld [vmem:[#allocation2] sm:$0xf]  ;;  %p355_p12 = scmp.lt.s32.totalorder %s349_s5, %s349_s5 }
  0x3d   :  { %v88_v24 = vsel %vm66_vm0, %v72_v16, 0.0  ;;  %v83_v25 = vadd.f32 %v82_v21, %v81_v20  ;;  %v84_v26 = vsel %vm66_vm0, %v77_v18, 0.0  ;;  %v85_v27 = vsel %vm66_vm0, %v78_v19, 0.0 }
  0x3e   :  { %v89_v28 = vadd.f32 %v88_v24, %v87_v17  ;;  %v86_v29 = vadd.f32 %v85_v27, %v84_v26  ;;  %v151_v30 = vadd.f32 %v150_v22, %v149_v15  ;;  %v153_v31 = vsel %vm66_vm0, %v146_v14, 0.0  ;;  %p356_p13 = por %p355_p12, %p354_p11 }
  0x3f   :  { %v92_v32 = vsel %vm66_vm0, %v83_v25, 0.0  ;;  %v154_v33 = vadd.f32 %v153_v31, %v152_v23  ;;  %v155_v34 = vmul.f32 %v485_v2, %v485_v2  ;;  %v156_v35 = vmul.f32 %v495_v7, %v495_v7 }
  0x40   :  { %90 = vadd.xlane.f32.xlu0 %v89_v28  ;;  %v93_v36 = vsel %vm66_vm0, %v86_v29, 0.0  ;;  %v169_v37 = vsel %vm66_vm0, %v151_v30, 0.0  ;;  %v407_v8 = vmov 1   ;;  %v409_v17 = vmov 2   ;;  %p357_p0 = pnand %p356_p13, %p350_p10 }
  0x41   :  { %v94_v38 = vadd.f32 %v93_v36, %v92_v32  ;;  %v170_v39 = vsel %vm66_vm0, %v154_v33, 0.0  ;;  %v159_v40 = vcombine.high %v155_v34, %v155_v34  ;;  %v160_v41 = vcombine.high %v156_v35, %v156_v35  ;;  %272 = vset.pattern.permute.xlu0 %v407_v8 }
  0x42   :  { %v171_v42 = vadd.f32 %v170_v39, %v169_v37  ;;  %v163_v43 = vsel %vm66_vm0, %v155_v34, 0.0  ;;  %v164_v44 = vsel %vm66_vm0, %v156_v35, 0.0  ;;  %v410_v18 = vmov 3  }
  0x43   :  { %95 = vadd.xlane.f32.xlu1 %v94_v38  ;;  %v165_v45 = vadd.f32 %v164_v44, %v163_v43  ;;  %v166_v46 = vsel %vm66_vm0, %v159_v40, 0.0  ;;  %v167_v47 = vsel %vm66_vm0, %v160_v41, 0.0  ;;  %v411_v23 = vmov 839922192  }
  0x44   :  { %172 = vadd.xlane.f32.xlu0 %v171_v42  ;;  %v168_v48 = vadd.f32 %v167_v47, %v166_v46  ;;  %v116_v24 = vunpack.c.l.s4 %v411_v23  ;;  %v118_v25 = vlaneseq }
  0x45   :  { %v174_v49 = vsel %vm66_vm0, %v165_v45, 0.0 }
  0x46   :  { %v175_v50 = vsel %vm66_vm0, %v168_v48, 0.0  ;;  %v117_v26 = vunpack.c.0.s8 %v116_v24  ;;  %v119_v27 = vshrl.u32 %v118_v25, 7 }
  0x47   :  { %v176_v51 = vadd.f32 %v175_v50, %v174_v49 }
  0x48   :  { %v120_v28 = vsub.s32 %v117_v26, %v119_v27 }
  0x49   :  { %177 = vadd.xlane.f32.xlu1 %v176_v51 }
  0xcd   :  { %v91_v53 = vpop.xlane.xlu0 %90 }
  0xce   :  { %v97_v54 = vmul.f32 0.001953125, %v91_v53 }
  0xd0   :  { %v99_v55 = vmul.f32 %v97_v54, %v97_v54  ;;  %v96_v56 = vpop.xlane.xlu1 %95 }
  0xd1   :  { %v98_v57 = vmul.f32 0.001953125, %v96_v56  ;;  %v173_v58 = vpop.xlane.xlu0 %172 }
  0xd2   :  { %v179_v59 = vmul.f32 0.001953125, %v173_v58 }
  0xd3   :  { %v100_v60 = vsub.f32 %v98_v57, %v99_v55 }
  0xd4   :  { %v181_v62 = vmul.f32 %v179_v59, %v179_v59 }
  0xd5   :  { %v101_v61 = vmax.f32 %v100_v60, 0.0 }
  0xd6   :  { %v178_v63 = vpop.xlane.xlu1 %177 }
  0xd7   :  { %v102_v3 = vadd.f32 1e-05, %v101_v61  ;;  %v180_v4 = vmul.f32 0.001953125, %v178_v63 }
  0xd9   :  { %279 = vrsqrt.f32 %v102_v3  ;;  %v182_v5 = vsub.f32 %v180_v4, %v181_v62 }
  0xdb   :  { %v183_v6 = vmax.f32 %v182_v5, 0.0 }
  0xdd   :  { %v184_v9 = vadd.f32 1e-05, %v183_v6 }
  0xdf   :  { %281 = vrsqrt.f32 %v184_v9 }
  0xe3   :  { %v280_v11 = vpop.eup %279 }
  0xe4   :  { %v104_v12 = vmul.f32 %v280_v11, %v57_v10 }
  0xe6   :  { %v105_v13 = vmul.f32 %v104_v12, %v97_v54 }
  0xe8   :  { %107 = vrot.lane.b32.xlu0 %v105_v13, %s408_s2 }
  0xe9   :  { %v282_v14 = vpop.eup %281 }
  0xea   :  { %v186_v15 = vmul.f32 %v282_v14, %v57_v10 }
  0xec   :  { %v187_v16 = vmul.f32 %v186_v15, %v179_v59 }
  0xee   :  { %189 = vrot.lane.b32.xlu1 %v187_v16, %s408_s2 }
  0xf2   :  { %113 = vperm.xlu1 %270, %v104_v12  }
  0xf6   :  { %271 = vset.pattern.permute.xlu1 %v409_v17 }
  0xf7   :  { %195 = vperm.xlu1 %271, %v186_v15  }
  0xfb   :  { %273 = vset.pattern.permute.xlu1 %v410_v18 }
 0x15a   :  { %v108_v19 = vpop.permute.xlu0 %107 }
 0x15b   :  { %v110_v20 = vsub.f32 %v57_v10, %v108_v19 }
 0x15d   :  { %127 = vperm.xlu0 %272, %v110_v20  }
 0x160   :  { %v190_v21 = vpop.permute.xlu1 %189 }
 0x161   :  { %v192_v22 = vsub.f32 %v57_v10, %v190_v21  ;;  %274 = vset.pattern.permute.xlu0 %v410_v18 }
 0x163   :  { %209 = vperm.xlu1 %273, %v192_v22  }
 0x171   :  { %v114_v29 = vpop.permute.xlu1 %113 }
 0x172   :  { %v121_v30 = vrot.slane %v114_v29, %v120_v28 }
 0x174   :  { %v123_v33 = vmul.f32 %v121_v30, %v481_v0  ;;  %v124_v34 = vmul.f32 %v121_v30, %v483_v1 }
 0x176   :  { %v196_v31 = vpop.permute.xlu1 %195 }
 0x177   :  { %v203_v36 = vrot.slane %v196_v31, %v120_v28 }
 0x1dc   :  { %v128_v32 = vpop.permute.xlu0 %127 }
 0x1dd   :  { %v135_v35 = vrot.slane %v128_v32, %v120_v28 }
 0x1df   :  { %v137_v37 = vadd.f32 %v135_v35, %v123_v33  ;;  %v138_v38 = vadd.f32 %v135_v35, %v124_v34 }
 0x1e1   :  { %139 = vst [vmem:[#allocation8] sm:$0xff] %v137_v37  ;;  %140 = vst [vmem:[#allocation8 + $0x8] sm:$0xff] %v138_v38 }
 0x1e2   :  { %v210_v39 = vpop.permute.xlu1 %209 }
 0x1e3   :  { %360 = shalt.err (!%p357_p0)
}
 0x1e4   :  { %s361_s8 = scalar_lea.hbm %s570_s3, 256 }
 0x1e5   :  { %p362_p1 = scmp.ne.s32.totalorder %s570_s3, %s361_s8  ;;  %p365_p2 = scmp.lt.u32.totalorder %s361_s8, %s570_s3 }
 0x1e7   :  { %p367_p3 = pnand %p365_p2, %p362_p1 }
 0x1e9   :  { %370 = shalt.err (!%p367_p3)
}
 0x1ea   :  { %234 = dma.vmem_to_hbm [thread:$0]  %s229_s28, 256, %s570_s3, [#allocation4], %s402_s25, %s402_s25, %s403_s26   ;;  %v205_v0 = vmul.f32 %v203_v36, %v485_v2  ;;  %v206_v1 = vmul.f32 %v203_v36, %v495_v7  ;;  %v217_v40 = vrot.slane %v210_v39, %v120_v28 }
 0x1eb   :  { %s371_s14 = scalar_lea.vmem %s241_s30, 256  ;;  %p376_p5 = scmp.lt.s32.totalorder %s241_s30, %s241_s30 }
 0x1ec   :  { %v219_v41 = vadd.f32 %v217_v40, %v205_v0  ;;  %v220_v42 = vadd.f32 %v217_v40, %v206_v1  ;;  %p372_p4 = scmp.ne.s32.totalorder %s241_s30, %s371_s14  ;;  %p377_p6 = scmp.lt.s32.totalorder %s371_s14, %s371_s14 }
 0x1ee   :  { %221 = vst [vmem:[#allocation9] sm:$0xff] %v219_v41  ;;  %222 = vst [vmem:[#allocation9 + $0x8] sm:$0xff] %v220_v42  ;;  %p378_p7 = por %p377_p6, %p376_p5 }
 0x1f0   :  { %p379_p8 = pnand %p378_p7, %p372_p4 }
 0x1f2   :  { %382 = shalt.err (!%p379_p8)
}
 0x1f3   :  { %s383_s3 = scalar_lea.hbm %s571_s4, 256 }
 0x1f4   :  { %p384_p9 = scmp.ne.s32.totalorder %s571_s4, %s383_s3  ;;  %p387_p10 = scmp.lt.u32.totalorder %s383_s3, %s571_s4 }
 0x1f6   :  { %p389_p11 = pnand %p387_p10, %p384_p9 }
 0x1f8   :  { %392 = shalt.err (!%p389_p11)
}
 0x1f9   :  { %246 = dma.vmem_to_hbm [thread:$0]  %s241_s30, 256, %s571_s4, [#allocation10], %s402_s25, %s402_s25, %s403_s26  }
 0x1fa   :  { %397 = dma.done.wait [#allocation4], 256  }
 0x1fb   :  { %398 = vsyncadd [#allocation4], 4294967040 }
 0x1fc   :  { %399 = dma.done.wait [#allocation10], 256  }
 0x1fd   :  { %400 = vsyncadd [#allocation10], 4294967040 }
 0x1fe   :  { %253 = vsyncpa [#allocation3], 1 }
 0x1ff   :  { %254 = vsyncpa [#allocation6], 1 }
 0x200   :  { %255 = vsyncpa [#allocation4], 1 }
 0x201   :  { %256 = vsyncpa [#allocation10], 1 }

</bundles_post_ra>
